<compile_context>
chip_gen: v7x
topology: tpu7x:2x2x1
jax: 0.10.0
libtpu: 0.0.40
codegen_flags: <defaults>
</compile_context>

<pallas_src>
import functools

import jax
import jax.numpy as jnp
from jax.experimental import pallas as pl
from jax.experimental.pallas import tpu as pltpu


def _cosine_cost_kernel(topic_norm_ref, emb_ref, out_ref):
    """One (batch, vocab-tile) step: out[0,k,v] = 1 - <t_norm[k], normalize(e[v])>.

    The vocab tile is fed RAW to the MXU; normalization is applied afterwards
    to the [K, tile_v] similarity matrix (16x smaller than the tile for K=8,
    D=128), so no [tile_v, D] normalized copy is materialized in VMEM.  The
    per-row sum of squares is computed lane-oriented ([1, tile_v]) with a
    ones-row MXU matmul so the rsqrt scale broadcasts over K without any
    sublane->lane relayout.
    """
    t_norm = topic_norm_ref[0]          # [K, D], pre-normalized topic rows
    e = emb_ref[0]                      # [TV, D], raw vocab rows (f32 or bf16)

    # Row sums of squares, directly lane-oriented: ones[1,D] . (e*e)^T -> [1,TV].
    ee = e * e
    ones_row = jnp.ones((1, ee.shape[-1]), dtype=ee.dtype)
    sumsq = jax.lax.dot_general(
        ones_row, ee, dimension_numbers=(((1,), (1,)), ((), ())),
        preferred_element_type=jnp.float32)                  # [1, TV] f32

    # torch normalize(dim=1, eps=1e-12): x / max(||x||, eps)
    #   == x * rsqrt(max(||x||^2, eps^2))  (sqrt is monotone).
    inv_norm = jax.lax.rsqrt(jnp.maximum(sumsq, jnp.float32(1e-24)))

    # [K, D] x [TV, D]^T -> [K, TV] on the MXU with f32 accumulation.
    sim = jax.lax.dot_general(
        t_norm, e, dimension_numbers=(((1,), (1,)), ((), ())),
        preferred_element_type=jnp.float32)                  # [K, TV] f32

    # NOTE(ragged tail): for a partial last vocab tile, rows of `e` past the
    # array end hold stale VMEM contents and may yield Inf/NaN here.  That
    # garbage is confined to the out-of-bounds *columns* (both the contraction
    # and the norm reduce over D, never across V), and those columns are
    # masked on writeback by Pallas, so it never reaches valid output.
    out_ref[0] = (jnp.float32(1.0) - sim * inv_norm).astype(out_ref.dtype)


@functools.partial(jax.jit, static_argnames=("tile_v", "stream_dtype"))
def cosine_cost_matrix_batched(topic_emb, ptr_emb, *, tile_v=8192,
                               stream_dtype=None):
    """1 - normalize(topic_emb[b]) @ normalize(ptr_emb[b]).T for each batch b.

    topic_emb : [B, K, D], ptr_emb : [B, V, D]  ->  [B, K, V] float32.
    `stream_dtype=jnp.bfloat16` streams ptr_emb (and the pre-normalized topic
    block) in bf16 to halve HBM input bytes; accumulation stays f32.
    """
    B, K, D = topic_emb.shape
    B2, V, D2 = ptr_emb.shape
    if B != B2 or D != D2:
        raise ValueError("batch / embedding dims must match")

    compute_dtype = (jnp.dtype(stream_dtype) if stream_dtype is not None
                     else jnp.dtype(jnp.float32))

    # Topic-row normalization hoisted out of the grid (tiny, resident [B,K,D]):
    # exact f32 (matches torch eps=1e-12), then cast to the streaming dtype so
    # both MXU operands share a dtype.
    t = topic_emb.astype(jnp.float32)
    t_norm = t / jnp.maximum(
        jnp.sqrt(jnp.sum(t * t, axis=-1, keepdims=True)), jnp.float32(1e-12))
    t_norm = t_norm.astype(compute_dtype)
    ptr_emb = ptr_emb.astype(compute_dtype)

    # Vocab tile:
    #  * big (HBM-read-bound kernel), default 8192 rows,
    #  * clamped to the 128-padded vocab (cdiv grid handles a ragged tail),
    #  * clamped to half the padded vocab (never below 128 lanes) so the grid
    #    has >=2 steps whenever possible and the 'parallel' axes can shard
    #    across both v7x TensorCores.
    padded_v = pl.cdiv(V, 128) * 128
    half_v = max(128, pl.cdiv(V, 2 * 128) * 128)
    tile_v_eff = int(max(128, min(tile_v, padded_v, half_v)))
    grid = (B, pl.cdiv(V, tile_v_eff))

    # VMEM budget: double-buffered ptr/out/topic tiles plus in-kernel temps
    # (the e*e slab in the streaming dtype and the f32 sim tile), with slack.
    # Capped at 48 MiB, below v7x's 64 MiB physical VMEM per TensorCore.
    in_itemsize = jnp.dtype(compute_dtype).itemsize
    vmem_bytes = (2 * tile_v_eff * D * in_itemsize    # ptr tiles (double-buffered)
                  + 2 * K * tile_v_eff * 4            # out tiles (double-buffered)
                  + 2 * K * D * 4                     # topic block
                  + tile_v_eff * D * in_itemsize      # in-kernel e*e temp
                  + K * tile_v_eff * 4                # in-kernel sim temp
                  + (8 << 20))                        # internal scratch + slack
    vmem_limit = int(min(max(vmem_bytes, 32 << 20), 48 << 20))

    grid_spec = pltpu.PrefetchScalarGridSpec(
        num_scalar_prefetch=0,
        grid=grid,
        in_specs=[
            pl.BlockSpec((1, K, D), lambda b, j: (b, 0, 0)),            # topics
            pl.BlockSpec((1, tile_v_eff, D), lambda b, j: (b, j, 0)),   # vocab tile
        ],
        out_specs=pl.BlockSpec((1, K, tile_v_eff), lambda b, j: (b, 0, j)),
    )
    return pl.pallas_call(
        _cosine_cost_kernel,
        out_shape=jax.ShapeDtypeStruct((B, K, V), jnp.float32),
        grid_spec=grid_spec,
        compiler_params=pltpu.CompilerParams(
            dimension_semantics=("parallel", "parallel"),
            vmem_limit_bytes=vmem_limit),
    )(t_norm, ptr_emb)


@functools.partial(jax.jit, static_argnames=("tile_v", "stream_dtype"))
def cosine_cost_matrix(topic_emb, ptr_emb, *, tile_v=8192, stream_dtype=None):
    """Unbatched convenience wrapper: [K, D] x [V, D] -> [K, V]."""
    return cosine_cost_matrix_batched(
        topic_emb[None], ptr_emb[None], tile_v=tile_v,
        stream_dtype=stream_dtype)[0]


class PallasModel:
    """Minimal JAX/Pallas analogue of the PyTorch `Model` wrapper.

    Holds deterministic topic embeddings for the word space and structure
    space and builds the cosine cost matrices with the Pallas kernel, mirroring
    `generate_topic_word_cost_matrix` / `generate_topic_str_cost_matrix`.
    """

    def __init__(self, num_topics, ptr_word_emb_dim, ptr_str_emb_dim, key):
        kw, ks = jax.random.split(key)
        # nn.Embedding default init ~ N(0, 1); deterministic via PRNGKey.
        self.topic_emb_word = jax.random.normal(
            kw, (num_topics, ptr_word_emb_dim), dtype=jnp.float32)
        self.topic_emb_str = jax.random.normal(
            ks, (num_topics, ptr_str_emb_dim), dtype=jnp.float32)

    def forward(self, ptr_word_emb, ptr_str_emb, model_name="d2bn",
                stream_dtype=None):
        if model_name != "d2bn":
            word = cosine_cost_matrix(self.topic_emb_word, ptr_word_emb,
                                      stream_dtype=stream_dtype)
            # TODO(synk): encoder (doc_topic_dist, mean, kld, att) and decoder
            # (OT reconstruction loss) are undefined in the reference source.
            return word, None

        # Batch word-space + structure-space into ONE pallas_call when shapes
        # match and the ptr tensors are small (launch overhead dominated
        # regime); for large V the extra stack copy would cost more HBM
        # traffic than it saves, so fall back to two launches.
        same_shapes = (self.topic_emb_word.shape == self.topic_emb_str.shape
                       and ptr_word_emb.shape == ptr_str_emb.shape
                       and ptr_word_emb.dtype == ptr_str_emb.dtype)
        small = ptr_word_emb.size * ptr_word_emb.dtype.itemsize <= (8 << 20)
        if same_shapes and small:
            topics = jnp.stack([self.topic_emb_word, self.topic_emb_str])
            ptrs = jnp.stack([ptr_word_emb, ptr_str_emb])
            costs = cosine_cost_matrix_batched(topics, ptrs,
                                               stream_dtype=stream_dtype)
            return costs[0], costs[1]

        word = cosine_cost_matrix(self.topic_emb_word, ptr_word_emb,
                                  stream_dtype=stream_dtype)
        struct = cosine_cost_matrix(self.topic_emb_str, ptr_str_emb,
                                    stream_dtype=stream_dtype)
        return word, struct


def _reference(topic_emb, ptr_emb):
    eps = 1e-12
    tn = topic_emb / jnp.maximum(
        jnp.linalg.norm(topic_emb, axis=1, keepdims=True), eps)
    en = ptr_emb / jnp.maximum(
        jnp.linalg.norm(ptr_emb, axis=1, keepdims=True), eps)
    return 1.0 - tn @ en.T


if __name__ == "__main__":
    key = jax.random.PRNGKey(0)
    k_model, k_word, k_str = jax.random.split(key, 3)

    num_topics = 8
    emb_dim = 128          # ptr_word_emb_dim == ptr_str_emb_dim
    num_words = 256        # vocabulary size
    num_docs = 256         # structure-embedding rows

    model = PallasModel(num_topics, emb_dim, emb_dim, k_model)
    ptr_word_emb = jax.random.normal(k_word, (num_words, emb_dim),
                                     dtype=jnp.float32)
    ptr_str_emb = jax.random.normal(k_str, (num_docs, emb_dim),
                                    dtype=jnp.float32)

    ref_word = _reference(model.topic_emb_word, ptr_word_emb)
    ref_str = _reference(model.topic_emb_str, ptr_str_emb)

    # f32 path (exact module semantics): batched single-launch d2bn forward.
    topic_word_cost, topic_str_cost = model.forward(ptr_word_emb, ptr_str_emb)
    jax.block_until_ready((topic_word_cost, topic_str_cost))
    assert topic_word_cost.shape == (num_topics, num_words)
    assert topic_str_cost.shape == (num_topics, num_docs)
    assert float(jnp.max(jnp.abs(topic_word_cost - ref_word))) < 2e-5
    assert float(jnp.max(jnp.abs(topic_str_cost - ref_str))) < 2e-5

    # bf16-streaming path (halves HBM input bytes); looser tolerance.
    tw16, ts16 = model.forward(ptr_word_emb, ptr_str_emb,
                               stream_dtype=jnp.bfloat16)
    jax.block_until_ready((tw16, ts16))
    assert float(jnp.max(jnp.abs(tw16 - ref_word))) < 2e-2
    assert float(jnp.max(jnp.abs(ts16 - ref_str))) < 2e-2

    # Ragged vocab tail (V not a multiple of the tile): exercises the masked
    # writeback of the partial last block and the unbatched wrapper.
    num_ragged = 200
    ragged_cost = cosine_cost_matrix(model.topic_emb_word,
                                     ptr_word_emb[:num_ragged])
    jax.block_until_ready(ragged_cost)
    ref_ragged = _reference(model.topic_emb_word, ptr_word_emb[:num_ragged])
    assert ragged_cost.shape == (num_topics, num_ragged)
    assert float(jnp.max(jnp.abs(ragged_cost - ref_ragged))) < 2e-5

    print("KERNEL_OK")
</pallas_src>

<mosaic_0001>
module attributes {stable_mosaic.version = 11 : i64} {
  func.func @_cosine_cost_kernel(%arg0: i32, %arg1: i32, %arg2: memref<1x8x128xf32, #tpu.memory_space<vmem>>, %arg3: memref<1x128x128xf32, #tpu.memory_space<vmem>>, %arg4: memref<1x8x128xf32, #tpu.memory_space<vmem>>) attributes {dimension_semantics = [#tpu.dimension_semantics<parallel>, #tpu.dimension_semantics<parallel>], iteration_bounds = array<i64: 2, 2>, scalar_prefetch = 0 : i64, scratch_operands = 0 : i64, tpu.core_type = #tpu.core_type<tc>, window_params = [{transform_indices = @transform_0, window_bounds = array<i64: 1, 8, 128>}, {transform_indices = @transform_1, window_bounds = array<i64: 1, 128, 128>}, {transform_indices = @transform_2, window_bounds = array<i64: 1, 8, 128>}]} {
    %c0 = arith.constant 0 : index
    %c0_0 = arith.constant 0 : index
    %c0_1 = arith.constant 0 : index
    %0 = vector.load %arg2[%c0, %c0_0, %c0_1] : memref<1x8x128xf32, #tpu.memory_space<vmem>>, vector<1x8x128xf32>
    %1 = vector.shape_cast %0 : vector<1x8x128xf32> to vector<8x128xf32>
    %c0_2 = arith.constant 0 : index
    %c0_3 = arith.constant 0 : index
    %c0_4 = arith.constant 0 : index
    %2 = vector.load %arg3[%c0_2, %c0_3, %c0_4] : memref<1x128x128xf32, #tpu.memory_space<vmem>>, vector<1x128x128xf32>
    %3 = vector.shape_cast %2 : vector<1x128x128xf32> to vector<128x128xf32>
    %4 = arith.mulf %3, %3 : vector<128x128xf32>
    %cst = arith.constant 1.000000e+00 : f32
    %5 = vector.broadcast %cst : f32 to vector<1x128xf32>
    %cst_5 = arith.constant dense<0.000000e+00> : vector<1x128xf32>
    %6 = tpu.matmul %5, %4, %cst_5 {dimension_numbers = #tpu.dot_dimension_numbers<[1], [1], [0], [0], [0, 0, 1, 0], [], []>} : vector<1x128xf32>, vector<128x128xf32>, vector<1x128xf32> -> vector<1x128xf32>
    %cst_6 = arith.constant 1.000000e-24 : f32
    %7 = vector.broadcast %cst_6 : f32 to vector<1x128xf32>
    %8 = arith.maximumf %6, %7 : vector<1x128xf32>
    %9 = math.rsqrt %8 : vector<1x128xf32>
    %cst_7 = arith.constant dense<0.000000e+00> : vector<8x128xf32>
    %10 = tpu.matmul %1, %3, %cst_7 {dimension_numbers = #tpu.dot_dimension_numbers<[1], [1], [0], [0], [0, 0, 1, 0], [], []>} : vector<8x128xf32>, vector<128x128xf32>, vector<8x128xf32> -> vector<8x128xf32>
    %11 = vector.broadcast %9 : vector<1x128xf32> to vector<8x128xf32>
    %12 = arith.mulf %10, %11 : vector<8x128xf32>
    %cst_8 = arith.constant 1.000000e+00 : f32
    %13 = vector.broadcast %cst_8 : f32 to vector<8x128xf32>
    %14 = arith.subf %13, %12 : vector<8x128xf32>
    %c0_9 = arith.constant 0 : index
    %c0_10 = arith.constant 0 : index
    %c0_11 = arith.constant 0 : index
    %15 = vector.load %arg4[%c0_9, %c0_10, %c0_11] : memref<1x8x128xf32, #tpu.memory_space<vmem>>, vector<1x8x128xf32>
    %16 = vector.shape_cast %15 : vector<1x8x128xf32> to vector<8x128xf32>
    %17 = vector.shape_cast %14 : vector<8x128xf32> to vector<1x8x128xf32>
    tpu.vector_store %arg4[%c0_9, %c0_10, %c0_11], %17 {strides = array<i32>} : memref<1x8x128xf32, #tpu.memory_space<vmem>>, vector<1x8x128xf32>,
    return
  }
  func.func @transform_0(%arg0: i32, %arg1: i32) -> (i32, i32, i32) {
    %c0_i32 = arith.constant 0 : i32
    %c0_i32_0 = arith.constant 0 : i32
    %c0_i32_1 = arith.constant 0 : i32
    return %arg0, %c0_i32, %c0_i32_0 : i32, i32, i32
  }
  func.func @transform_1(%arg0: i32, %arg1: i32) -> (i32, i32, i32) {
    %c0_i32 = arith.constant 0 : i32
    %c0_i32_0 = arith.constant 0 : i32
    return %arg0, %arg1, %c0_i32 : i32, i32, i32
  }
  func.func @transform_2(%arg0: i32, %arg1: i32) -> (i32, i32, i32) {
    %c0_i32 = arith.constant 0 : i32
    %c0_i32_0 = arith.constant 0 : i32
    return %arg0, %c0_i32, %arg1 : i32, i32, i32
  }
}

</mosaic_0001>

<bundles_post_ra>
// kernel: cosine_cost_matrix_batched.1
= control target key start
LH: loop header
LB: loop body
LE: loop exit
PB: predicated region body
PF: predicated region fallthrough
CT: control target
= control target key end

     0   :  { %7 = vsyncpa [#allocation3], 0  ;;  %s1135_s0 = inlined_call_operand.vmem [shape: f32[2,8,128], index: 0, kind: input, shape index: {}]   ;;  %s1136_s1 = inlined_call_operand.hbm [shape: f32[2,256,128], index: 1, kind: input, shape index: {}]   ;;  %s1137_s2 = inlined_call_operand.hbm [shape: f32[2,8,256], index: 2, kind: output, shape index: {}]  }
   0x1   :  { %9 = vsyncpa [#allocation3 + $0x1], 0 }
   0x2   :  { %10 = vsyncpa [#allocation4], 0 }
   0x3   :  { %12 = vsyncpa [#allocation4 + $0x1], 0  ;;  %s902_s9 = smov 0   ;;  %s904_s10 = smov 0  }
   0x4   :  { %s906_s11 = smov 0   ;;  %s908_s12 = smov 0  }
   0x5   :  { %s910_s13 = smov 0   ;;  %s912_s14 = smov 0  }
   0x6   :  { %s914_s15 = smov 0   ;;  %s916_s16 = smov 0  }
   0x7 LB: > { %s494_s17 = sadd.s32 4294967295, %s877_s16   ;;  %s495_s18 = sadd.s32 4294967294, %s877_s16   ;;  %s877_s16 = sphi %s916_s16, %s18_s16   ;;  %s873_s15 = sphi %s914_s15, %s1152_s15   ;;  %s869_s14 = sphi %s912_s14, %s1151_s14   ;;  %s865_s13 = sphi %s910_s13, %s1150_s13   ;;  %s861_s12 = sphi %s908_s12, %s1149_s12   ;;  %s857_s11 = sphi %s906_s11, %s1148_s11   ;;  %s853_s10 = sphi %s904_s10, %s1147_s10   ;;  %s849_s9 = sphi %s902_s9, %s1146_s9  }
   0x8   : > { %s27_s19 = sadd.s32 1, %s869_s14  ;;  %s30_s20 = sadd.s32 1, %s873_s15 }
   0x9   : > { %p28_p0 = scmp.ge.s32.totalorder %s27_s19, 2  ;;  %s65_s21 = sadd.s32 1, %s857_s11 }
   0xa   : > { %p72_p1 = scmp.ne.s32.totalorder %s857_s11, %s853_s10  ;;  %p73_p2 = scmp.eq.s32.totalorder %s877_s16, 0 }
   0xb   : > { %s1154_s19 = smov (%p28_p0, %s27_s19), 0  ;;  %s1156_s20 = smov (!%p28_p0, %s30_s20), %s873_s15 }
   0xc   : > { %s61_s22 = ssub.s32 %s869_s14, %s1154_s19  ;;  %p955_p3 = por %p73_p2, %p72_p1 }
   0xd   : > { %p32_p4 = scmp.ge.s32.totalorder %s1156_s20, 2  ;;  %p78_p5 = scmp.ne.s32.totalorder %s853_s10, %s849_s9 }
   0xe   : > { %p79_p6 = scmp.eq.s32.totalorder %s494_s17, 0  ;;  %p104_p7 = scmp.eq.s32.totalorder %s494_s17, 3 }
   0xf   : > { %s1158_s20 = smov (%p32_p4, %s1156_s20), 0  ;;  %p110_p10 = scmp.eq.s32.totalorder %s495_s18, 3 }
  0x10   : > { %p963_p8 = por %p79_p6, %p78_p5  ;;  %p967_p9 = por %p104_p7, %p72_p1 }
  0x11   : > { %s60_s26 = ssub.s32 %s873_s15, %s1158_s20  ;;  %p973_p12 = por %p110_p10, %p78_p5 }
  0x12   : > { %s1141_s25 = scalar_select %p967_p9, 1, 0 }
  0x13   : > { %s62_s27 = sor.u32 %s61_s22, %s60_s26  ;;  %p675_p13 = scmp.lt.s32.totalorder %s877_s16, 4 }
  0x14   : > { %p63_p11 = scmp.eq.s32.totalorder %s62_s27, 0  ;;  %s137_s29 = sand.u32 1, %s857_s11  }
  0x15   : > { %s1142_s28 = scalar_select %p973_p12, 1, 0 }
  0x16   : > { %s980_s30 = scalar_select %p63_p11, %s857_s11, %s65_s21  }
  0x17   : > { %s498_s3 = sshll.u32 %s137_s29, 7  ;;  %s499_s4 = sshll.u32 %s869_s14, 4 }
  0x18   : > { %s500_s5 = sshll.u32 %s873_s15, 5  ;;  %s141_s6 = scalar_lea.vmem [#allocation2], %s498_s3 }
  0x19   : > { %s150_s7 = sshll.u32 %s141_s6, 4  ;;  %s147_s8 = sadd.s32 %s500_s5, %s499_s4  ;;  %s984_s7 = int_to_ptr.vmem [resolvable:$true] %s150_s7 }
  0x1a   : > { %s501_s17 = sshll.u32 %s147_s8, 7  ;;  %p988_p0 = pnand %p675_p13, %p955_p3 }
  0x1b   : > { %s995_s21 = scalar_lea.hbm %s1136_s1, %s501_s17  ;;  %s997_s27 = scalar_lea.sflag [#allocation3], %s137_s29 }
  0x1c   : > { %s749_s3 = scalar_lea.hbm %s995_s21, 2048  ;;  %p751_p2 = pneg %p988_p0 }
  0x1d   : > { %p750_p1 = scmp.ne.s32.totalorder %s995_s21, %s749_s3  ;;  %s754_s5 = scalar_lea.hbm %s1136_s1, 8192 }
  0x1e   : > { %p755_p5 = scmp.lt.u32.totalorder %s995_s21, %s1136_s1  ;;  %p756_p6 = scmp.lt.u32.totalorder %s754_s5, %s749_s3 }
  0x1f   : > { %p752_p3 = pnand %p751_p2, %p750_p1  ;;  %p758_p10 = scmp.lt.u32.totalorder %s749_s3, %s995_s21 }
  0x20   : > { %p757_p7 = por %p756_p6, %p755_p5 }
  0x21   : > { %p753_p4 = pneg %p752_p3 }
  0x22   : > { %p759_p11 = por %p758_p10, %p757_p7 }
  0x24   : > { %p760_p13 = pnand %p759_p11, %p753_p4 }
  0x26   : > { %763 = shalt.err (!%p760_p13)
}
  0x27   : > { %s764_s29 = scalar_lea.vmem %s984_s7, 2048  ;;  %s879_s17 = smov [#allocation2]  }
  0x28   : > { %p765_p1 = scmp.ne.s32.totalorder %s984_s7, %s764_s29  ;;  %s769_s22 = sshll.u32 %s879_s17, 4  ;;  %s770_s22 = int_to_ptr.vmem [resolvable:$false] %s769_s22 }
  0x29   : > { %s771_s26 = scalar_lea.vmem %s770_s22, 4096  ;;  %p772_p9 = scmp.lt.s32.totalorder %s984_s7, %s770_s22 }
  0x2a   : > { %p767_p3 = pnand %p765_p1, %p751_p2  ;;  %p773_p5 = scmp.lt.s32.totalorder %s771_s26, %s764_s29 }
  0x2c   : > { %p768_p12 = pneg %p767_p3  ;;  %p774_p6 = por %p773_p5, %p772_p9 }
  0x2e   : > { %p775_p7 = pnand %p774_p6, %p768_p12 }
  0x30   : > { %778 = shalt.err (!%p775_p7)
}
  0x31   : > { %s880_s3 = smov 128   ;;  %s881_s23 = smov 8  }
  0x32   : > { %670 = dma.hbm_to_vmem [thread:$0]  (!%p988_p0), %s995_s21, 2048, %s984_s7, %s997_s27, %s880_s3, %s880_s3, %s881_s23  }
  0x33   : > { %p502_p2 = scmp.ge.s32.totalorder %s877_s16, 1  ;;  %p158_p4 = scmp.lt.s32.totalorder %s877_s16, 5 }
  0x35   : > { %p159_p10 = pnand %p502_p2, %p158_p4 }
  0x36   : > { %s1028_s4 = sand.u32 (!%p159_p10), 1, %s853_s10  }
  0x37   : > { %162 = sbr.rel (%p159_p10) target bundleno = 376 (0x178), region = 28  ;;  %s503_s5 = sshll.u32 (!%p159_p10), %s1028_s4, 7 }
  0x38   : > { %s165_s6 = scalar_lea.sflag (!%p159_p10), [#allocation3], %s1028_s4  ;;  %s1032_s8 = scalar_lea.vmem (!%p159_p10), [#allocation2], %s503_s5 }
  0x3e   : > { %840 = dma.done.wait (%p963_p8), %s165_s6, 2048  }
  0x3f   : > { %842 = vsyncadd (%p963_p8), %s165_s6, 4294965248  ;;  %v882_v0 = vmov 0.0|0.0   ;;  %vm883_vm0 = vmmov 0   ;;  %v884_v1 = vmov 0.0   ;;  %v199_v2 = vld [vmem:[%s1032_s8] sm:$0xff]  ;;  %v200_v3 = vld [vmem:[%s1032_s8 + $0x8] sm:$0xff]  ;;  %v373_v57 = vlaneseq }
  0x40   : > { %615 = vmatprep.subr.bf16.mxu0 %v882_v0  ;;  %639 = vmatprep.subr.bf16.mxu1 %v882_v0  ;;  %v215_v4 = vmul.f32 %v199_v2, %v199_v2  ;;  %v216_v5 = vmul.f32 %v200_v3, %v200_v3  ;;  %v640_v6 = vpack.c.bf16 %v200_v3, %v199_v2  ;;  %v201_v7 = vld [vmem:[%s1032_s8 + $0x10] sm:$0xff]  ;;  %v202_v8 = vld [vmem:[%s1032_s8 + $0x18] sm:$0xff]  ;;  %v203_v14 = vld [vmem:[%s1032_s8 + $0x20] sm:$0xff]  ;;  %p193_p8 = scmp.lt.s32.totalorder %s865_s13, 1  ;;  %v885_v51 = vmov 1.0   ;;  %s504_s29 = sshll.u32 %s1028_s4, 3 }
  0x41   : > { %577 = vmatprep.mubr.msk.f32.mxu0 %vm883_vm0, %v884_v1  ;;  %612 = vmatprep.mubr.msk.f32.mxu1 %vm883_vm0, %v884_v1  ;;  %v217_v10 = vmul.f32 %v201_v7, %v201_v7  ;;  %v218_v11 = vmul.f32 %v202_v8, %v202_v8  ;;  %v643_v12 = vpack.c.bf16 %v202_v8, %v201_v7  ;;  %v204_v15 = vld [vmem:[%s1032_s8 + $0x28] sm:$0xff]  ;;  %v205_v20 = vld [vmem:[%s1032_s8 + $0x30] sm:$0xff]  ;;  %v206_v21 = vld [vmem:[%s1032_s8 + $0x38] sm:$0xff]  ;;  %v374_v58 = vshrl.u32 %v373_v57, 7  ;;  %s507_s17 = sshll.u32 %s865_s13, 1  ;;  %s192_s3 = scalar_lea.vmem [#allocation5], %s504_s29 }
  0x42   : > { %v616_v9 = vpack.c.bf16 %v216_v5, %v215_v4  ;;  %641 = vmatpush3.bf16.xpose.msra.mxu1 %v640_v6  ;;  %v219_v16 = vmul.f32 %v203_v14, %v203_v14  ;;  %v220_v17 = vmul.f32 %v204_v15, %v204_v15  ;;  %v646_v18 = vpack.c.bf16 %v204_v15, %v203_v14  ;;  %v207_v26 = vld [vmem:[%s1032_s8 + $0x40] sm:$0xff]  ;;  %v208_v27 = vld [vmem:[%s1032_s8 + $0x48] sm:$0xff]  ;;  %v209_v32 = vld [vmem:[%s1032_s8 + $0x50] sm:$0xff]  ;;  %s194_s24 = scalar_select %p193_p8, %s865_s13, 1 }
  0x43   : > { %642 = vmatprep.subr.bf16.mxu1 %v882_v0  ;;  %v619_v13 = vpack.c.bf16 %v218_v11, %v217_v10  ;;  %v221_v22 = vmul.f32 %v205_v20, %v205_v20  ;;  %v222_v23 = vmul.f32 %v206_v21, %v206_v21  ;;  %v649_v24 = vpack.c.bf16 %v206_v21, %v205_v20  ;;  %v210_v33 = vld [vmem:[%s1032_s8 + $0x58] sm:$0xff]  ;;  %v211_v38 = vld [vmem:[%s1032_s8 + $0x60] sm:$0xff]  ;;  %v212_v39 = vld [vmem:[%s1032_s8 + $0x68] sm:$0xff]  ;;  %s392_s22 = sadd.s32 %s861_s12, %s507_s17  ;;  %s396_s23 = sshll.u32 %s192_s3, 4  ;;  %s1083_s23 = int_to_ptr.vmem [resolvable:$true] %s396_s23 }
  0x44   : > { %617 = vmatpush3.bf16.xpose.msra.mxu0 %v616_v9  ;;  %v622_v19 = vpack.c.bf16 %v220_v17, %v219_v16  ;;  %v223_v28 = vmul.f32 %v207_v26, %v207_v26  ;;  %v224_v29 = vmul.f32 %v208_v27, %v208_v27  ;;  %v652_v30 = vpack.c.bf16 %v208_v27, %v207_v26  ;;  %v213_v44 = vld [vmem:[%s1032_s8 + $0x70] sm:$0xff]  ;;  %v214_v45 = vld [vmem:[%s1032_s8 + $0x78] sm:$0xff]  ;;  %s505_s7 = sshll.u32 %s194_s24, 3  ;;  %s508_s26 = sshll.u32 %s392_s22, 7 }
  0x45   : > { %618 = vmatprep.subr.bf16.mxu0 %v882_v0  ;;  %v625_v25 = vpack.c.bf16 %v222_v23, %v221_v22  ;;  %v225_v34 = vmul.f32 %v209_v32, %v209_v32  ;;  %v226_v35 = vmul.f32 %v210_v33, %v210_v33  ;;  %v655_v36 = vpack.c.bf16 %v210_v33, %v209_v32  ;;  %s196_s27 = scalar_lea.vmem %s1135_s0, %s505_s7  ;;  %s1081_s8 = scalar_lea.hbm %s1137_s2, %s508_s26 }
  0x46   : > { %v628_v31 = vpack.c.bf16 %v224_v29, %v223_v28  ;;  %v227_v40 = vmul.f32 %v211_v38, %v211_v38  ;;  %v228_v41 = vmul.f32 %v212_v39, %v212_v39  ;;  %v658_v42 = vpack.c.bf16 %v212_v39, %v211_v38  ;;  %v198_v50 = vld [vmem:[%s196_s27] sm:$0xff]  ;;  %s381_s13 = scalar_lea.sflag [#allocation4], %s1028_s4  ;;  %s779_s12 = scalar_lea.vmem %s1083_s23, 128 }
  0x47   : > { %v631_v37 = vpack.c.bf16 %v226_v35, %v225_v34  ;;  %v229_v46 = vmul.f32 %v213_v44, %v213_v44  ;;  %v230_v47 = vmul.f32 %v214_v45, %v214_v45  ;;  %v661_v48 = vpack.c.bf16 %v214_v45, %v213_v44  ;;  %p780_p9 = scmp.ne.s32.totalorder %s1083_s23, %s779_s12  ;;  %p1144_p12 = scmp.ne.s32.totalorder %s1141_s25, 0 }
  0x48   : > { %v634_v43 = vpack.c.bf16 %v228_v41, %v227_v40  ;;  %v375_v59 = vsub.s32 0, %v374_v58  ;;  %s886_s24 = smov [#allocation5]  }
  0x49   : > { %v637_v49 = vpack.c.bf16 %v230_v47, %v229_v46  ;;  %p781_p0 = pnand %p780_p9, %p1144_p12  ;;  %s783_s7 = sshll.u32 %s886_s24, 4  ;;  %s784_s7 = int_to_ptr.vmem [resolvable:$false] %s783_s7 }
  0x4a   : > { %644 = vmatpush3.bf16.xpose.msra.mxu1 %v643_v12  ;;  %s785_s18 = scalar_lea.vmem %s784_s7, 256  ;;  %p786_p13 = scmp.lt.s32.totalorder %s1083_s23, %s784_s7 }
  0x4b   : > { %645 = vmatprep.subr.bf16.mxu1 %v882_v0  ;;  %p782_p11 = pneg %p781_p0  ;;  %p787_p1 = scmp.lt.s32.totalorder %s785_s18, %s779_s12 }
  0x4c   : > { %620 = vmatpush3.bf16.xpose.msra.mxu0 %v619_v13 }
  0x4d   : > { %621 = vmatprep.subr.bf16.mxu0 %v882_v0  ;;  %p788_p3 = por %p787_p1, %p786_p13 }
  0x4f   : > { %p789_p5 = pnand %p788_p3, %p782_p11 }
  0x52   : > { %647 = vmatpush3.bf16.xpose.msra.mxu1 %v646_v18 }
  0x53   : > { %648 = vmatprep.subr.bf16.mxu1 %v882_v0 }
  0x54   : > { %623 = vmatpush3.bf16.xpose.msra.mxu0 %v622_v19 }
  0x55   : > { %624 = vmatprep.subr.bf16.mxu0 %v882_v0 }
  0x5a   : > { %650 = vmatpush3.bf16.xpose.msra.mxu1 %v649_v24 }
  0x5b   : > { %651 = vmatprep.subr.bf16.mxu1 %v882_v0 }
  0x5c   : > { %626 = vmatpush3.bf16.xpose.msra.mxu0 %v625_v25 }
  0x5d   : > { %627 = vmatprep.subr.bf16.mxu0 %v882_v0 }
  0x62   : > { %653 = vmatpush3.bf16.xpose.msra.mxu1 %v652_v30 }
  0x63   : > { %654 = vmatprep.subr.bf16.mxu1 %v882_v0 }
  0x64   : > { %629 = vmatpush3.bf16.xpose.msra.mxu0 %v628_v31 }
  0x65   : > { %630 = vmatprep.subr.bf16.mxu0 %v882_v0 }
  0x6a   : > { %656 = vmatpush3.bf16.xpose.msra.mxu1 %v655_v36 }
  0x6b   : > { %657 = vmatprep.subr.bf16.mxu1 %v882_v0 }
  0x6c   : > { %632 = vmatpush3.bf16.xpose.msra.mxu0 %v631_v37 }
  0x6d   : > { %633 = vmatprep.subr.bf16.mxu0 %v882_v0 }
  0x72   : > { %659 = vmatpush3.bf16.xpose.msra.mxu1 %v658_v42 }
  0x73   : > { %660 = vmatprep.subr.bf16.mxu1 %v882_v0 }
  0x74   : > { %635 = vmatpush3.bf16.xpose.msra.mxu0 %v634_v43 }
  0x75   : > { %636 = vmatprep.subr.bf16.mxu0 %v882_v0 }
  0x7a   : > { %662 = vmatpush3.bf16.xpose.msra.mxu1 %v661_v48 }
  0x7c   : > { %638 = vmatpush3.bf16.xpose.msra.mxu0 %v637_v49 }
  0x81   : > { %613 = vmatmul.mubr.f32.vlgmr.msra.gmra.mrb[0].mxu1 %v198_v50 }
  0x83   : > { %578 = vmatmul.mubr.f32.vlgmr.msra.gmra.mrb[0].mxu0 %v885_v51 }
 0x154   : > { %v369_v52 = vpop.f32.mrb[0].mxu1 }
 0x155   : > { %v614_v53 = vpop.f32.mrb[1].mxu1 }
 0x156   : > { %v297_v54 = vpop.f32.mrb[0].mxu0 }
 0x157   : > { %v301_v55 = vmax.f32 %v297_v54, 1e-24  ;;  %v579_v56 = vpop.f32.mrb[1].mxu0 }
 0x159   : > { %747 = vrsqrt.f32 %v301_v55 }
 0x163   : > { %v748_v60 = vpop.eup %747 }
 0x164   : > { %v376_v61 = vrot.slane %v748_v60, %v375_v59 }
 0x166   : > { %v377_v62 = vmul.f32 %v376_v61, %v369_v52 }
 0x168   : > { %v378_v63 = vsub.f32 1.0, %v377_v62 }
 0x16a   : > { %379 = vst [vmem:[%s192_s3] sm:$0xff] %v378_v63 }
 0x16b   : > { %792 = shalt.err (!%p789_p5)
}
 0x16c   : > { %s793_s4 = scalar_lea.hbm %s1081_s8, 128  ;;  %s797_s29 = scalar_lea.hbm %s1137_s2, 512 }
 0x16d   : > { %p794_p6 = scmp.ne.s32.totalorder %s1081_s8, %s793_s4  ;;  %p798_p4 = scmp.lt.u32.totalorder %s1081_s8, %s1137_s2 }
 0x16e   : > { %p799_p10 = scmp.lt.u32.totalorder %s797_s29, %s793_s4  ;;  %p801_p9 = scmp.lt.u32.totalorder %s793_s4, %s1081_s8 }
 0x16f   : > { %p795_p7 = pnand %p794_p6, %p1144_p12 }
 0x170   : > { %p800_p8 = por %p799_p10, %p798_p4 }
 0x171   : > { %p796_p2 = pneg %p795_p7 }
 0x172   : > { %p802_p0 = por %p801_p9, %p800_p8 }
 0x174   : > { %p803_p11 = pnand %p802_p0, %p796_p2 }
 0x176   : > { %806 = shalt.err (!%p803_p11)
}
 0x177   : > { %665 = dma.vmem_to_hbm [thread:$0]  (%p1144_p12), %s1083_s23, 128, %s1081_s8, %s381_s13  }
 0x178 PF: > { %p676_p13 = scmp.ge.s32.totalorder %s877_s16, 2  ;;  %s408_s26 = sand.u32 1, %s849_s9  }
 0x179   : > { %p1145_p1 = scmp.ne.s32.totalorder %s1142_s28, 0  ;;  %s409_s3 = scalar_lea.sflag [#allocation4], %s408_s26 }
 0x17b   : > { %p672_p3 = pnand %p676_p13, %p1145_p1 }
 0x17d   : > { %844 = dma.done.wait (!%p672_p3), %s409_s3, 128  }
 0x17e   : > { %846 = vsyncadd (!%p672_p3), %s409_s3, 4294967168  ;;  %s18_s16 = sadd.s32 1, %s877_s16   ;;  %s1146_s9 = smov %s853_s10 }
 0x17f   : > { %p15_p5 = scmp.ge.s32.totalorder %s18_s16, 6   ;;  %s1147_s10 = smov %s857_s11 }
 0x180   : > { %s1148_s11 = smov %s980_s30  ;;  %s1149_s12 = smov %s869_s14 }
 0x181   : > { %s1150_s13 = smov %s873_s15  ;;  %s1151_s14 = smov %s1154_s19 }
 0x182   : > { %s1152_s15 = smov %s1158_s20  ;;  %17 = sbr.rel (!%p15_p5) target bundleno = 7 (0x7), region = 76 }
 0x189   :  { %414 = vsyncpa [#allocation3], 1 }
 0x18a   :  { %416 = vsyncpa [#allocation3 + $0x1], 1 }
 0x18b   :  { %417 = vsyncpa [#allocation4], 1 }
 0x18c   :  { %419 = vsyncpa [#allocation4 + $0x1], 1 }

</bundles_post_ra>
